<compile_context>
chip_gen: v7x
topology: tpu7x:2x2x1
jax: 0.10.0
libtpu: 0.0.40
codegen_flags: <defaults>
</compile_context>

<pallas_src>
import jax
import jax.numpy as jnp
from jax.experimental import pallas as pl
from jax.experimental.pallas import tpu as pltpu

EPS = 1e-5  # nn.LayerNorm default


def prenorm_kernel(x_ref, wt_ref, b_ref, o_ref, normed_ref):
    # x_ref:      (TILE_M, D)   row tile of flattened (batch*seq, dim)
    # wt_ref:     (D, TN)       pre-transposed, gamma-folded weight slab
    # b_ref:      (1, TN)       beta-folded bias slab (f32)
    # o_ref:      (TILE_M, TN)  output tile
    # normed_ref: (TILE_M, D)   VMEM scratch holding the normalized rows
    #
    # LayerNorm is computed once per row tile (j == 0) and reused across all
    # weight/output slabs j > 0; stats always in f32.
    @pl.when(pl.program_id(1) == 0)
    def _():
        x = x_ref[...].astype(jnp.float32)
        mean = jnp.mean(x, axis=-1, keepdims=True)
        centered = x - mean
        var = jnp.mean(centered * centered, axis=-1, keepdims=True)
        inv_std = jax.lax.rsqrt(var + EPS)
        normed_ref[...] = (centered * inv_std).astype(normed_ref.dtype)

    # fn = Linear(dim, dim): pure MXU matmul with f32 accumulation.
    out = jnp.dot(
        normed_ref[...],                   # bf16 feed when W is bf16
        wt_ref[...],
        preferred_element_type=jnp.float32,
    ) + b_ref[...]
    o_ref[...] = out.astype(o_ref.dtype)


def _round_up(x, m):
    return (x + m - 1) // m * m


def prenorm_linear(x, gamma, beta, w, b, *, matmul_dtype=None, tile_m=None):
    """x: (B, S, D) -> (B, S, D).  Fused LayerNorm + Linear(D, D)."""
    B, S, D = x.shape
    rows = B * S
    if matmul_dtype is None:
        matmul_dtype = x.dtype
    matmul_dtype = jnp.dtype(matmul_dtype)
    x_bytes = jnp.dtype(x.dtype).itemsize
    w_bytes = matmul_dtype.itemsize

    # ---- one-time param folding (hoisted out of the kernel) ----------------
    # (normed*gamma + beta) @ W^T + b == normed @ (gamma[:,None]*W^T) + (beta@W^T + b)
    wt_f32 = jnp.asarray(w, jnp.float32).T                      # (in, out)
    wt = (gamma.reshape(D, 1).astype(jnp.float32) * wt_f32).astype(matmul_dtype)
    b2d = (beta.reshape(1, D).astype(jnp.float32) @ wt_f32
           + b.reshape(1, D).astype(jnp.float32))               # (1, D) f32

    # ---- VMEM budget & per-generation defaults -----------------------------
    try:
        vmem_cap = int(pltpu.get_tpu_info().vmem_capacity_bytes)
    except Exception:  # pragma: no cover - be conservative if query fails
        vmem_cap = 64 * 1024 * 1024       # v7x per-TC VMEM
    budget = int(vmem_cap * 0.75)
    if tile_m is None:
        # 128 MiB chips (v5e/v6e, HBM-bound at mid D) -> bigger row tiles;
        # 64 MiB/TC chips (v7x) -> smaller tiles for fit + 2-TC coverage.
        tile_m = 1024 if vmem_cap >= (100 << 20) else 256

    # ---- weight placement: resident vs streamed along the output dim -------
    if D * D * w_bytes <= budget // 2 or D % 128 != 0:
        tn, weight_resident = D, True          # whole W'^T resident, 1 buffer
    else:
        tn = 512 if D % 512 == 0 else (256 if D % 256 == 0 else 128)
        while tn > 128 and 2 * D * tn * w_bytes > budget // 2:
            tn //= 2
        weight_resident = (tn == D)
    nt = D // tn

    # ---- row tiling ---------------------------------------------------------
    row_align = 8 if (x_bytes == 4 and w_bytes == 4) else 16

    def vmem_estimate(tile):
        w_bufs = 1 if weight_resident else 2
        return (D * tn * w_bytes * w_bufs          # weight slab(s)
                + 2 * tile * D * x_bytes           # double-buffered x tile
                + 2 * tile * tn * x_bytes          # double-buffered out tile
                + w_bufs * tn * 4                  # bias slab(s)
                + tile * D * w_bytes               # normalized-rows scratch
                + 3 * tile * D * 4)                # f32 LN temporaries

    # Cap so the row grid has >= ~4 steps (megacore coverage) and pad waste is
    # bounded by the (now smaller) tile, then shrink until it fits VMEM.
    cap = min(tile_m, max(row_align, _round_up(pl.cdiv(rows, 4), row_align)))
    tile = cap
    while tile > row_align and vmem_estimate(tile) > budget:
        tile = max(row_align, _round_up(tile // 2, row_align))

    padded_rows = _round_up(rows, tile)
    x2d = x.reshape(rows, D)
    if padded_rows != rows:
        x2d = jnp.pad(x2d, ((0, padded_rows - rows), (0, 0)))

    vmem_limit = int(min(vmem_cap,
                         max(32 << 20, vmem_estimate(tile) * 5 // 4 + (2 << 20))))

    # ---- specs --------------------------------------------------------------
    if weight_resident:
        # Constant index_map: single-buffer the resident operands so the
        # weight costs D*D bytes, not 2*D*D.
        w_spec = pl.BlockSpec((D, tn), lambda i, j: (0, j),
                              pipeline_mode=pl.Buffered(1))
        b_spec = pl.BlockSpec((1, tn), lambda i, j: (0, j),
                              pipeline_mode=pl.Buffered(1))
    else:
        # Streamed weight slabs: default double-buffering hides the DMA
        # under the MXU.
        w_spec = pl.BlockSpec((D, tn), lambda i, j: (0, j))
        b_spec = pl.BlockSpec((1, tn), lambda i, j: (0, j))

    out2d = pl.pallas_call(
        prenorm_kernel,
        out_shape=jax.ShapeDtypeStruct((padded_rows, D), x.dtype),
        grid_spec=pltpu.PrefetchScalarGridSpec(
            num_scalar_prefetch=0,
            grid=(padded_rows // tile, nt),
            in_specs=[
                # x tile: index does not change across j -> fetched once per i.
                pl.BlockSpec((tile, D), lambda i, j: (i, 0)),
                w_spec,
                b_spec,
            ],
            out_specs=pl.BlockSpec((tile, tn), lambda i, j: (i, j)),
            scratch_shapes=[pltpu.VMEM((tile, D), matmul_dtype)],
        ),
        compiler_params=pltpu.CompilerParams(
            # Row tiles are independent -> shard across 2 TCs on v7x.
            # The N axis reuses the per-row-tile LN scratch -> "arbitrary".
            dimension_semantics=("parallel", "arbitrary"),
            vmem_limit_bytes=vmem_limit,
        ),
    )(x2d, wt, b2d)

    if padded_rows != rows:
        out2d = out2d[:rows]
    return out2d.reshape(B, S, D)


def prenorm_reference(x, gamma, beta, w, b, *, matmul_dtype=None):
    """Pure-JAX reference mirroring nn.LayerNorm + nn.Linear numerics."""
    if matmul_dtype is None:
        matmul_dtype = x.dtype
    xf = x.astype(jnp.float32)
    mean = jnp.mean(xf, axis=-1, keepdims=True)
    var = jnp.mean((xf - mean) ** 2, axis=-1, keepdims=True)
    normed = (xf - mean) * jax.lax.rsqrt(var + EPS)
    normed = normed * gamma.astype(jnp.float32) + beta.astype(jnp.float32)
    out = jnp.dot(
        normed.astype(matmul_dtype),
        jnp.asarray(w, dtype=matmul_dtype).T,
        preferred_element_type=jnp.float32,
    ) + b.astype(jnp.float32)
    return out.astype(x.dtype)


if __name__ == "__main__":
    key = jax.random.PRNGKey(0)
    B, S, D = 2, 8, 32  # small test shape: batch=2, seq=8, hidden=32

    k_x, k_g, k_b, k_w, k_bias = jax.random.split(key, 5)
    x = jax.random.normal(k_x, (B, S, D), dtype=jnp.float32)

    # LayerNorm params (PyTorch init gamma=1, beta=0; perturb so the affine
    # path is exercised).
    gamma = jnp.ones((D,), jnp.float32) + 0.1 * jax.random.normal(k_g, (D,), jnp.float32)
    beta = 0.1 * jax.random.normal(k_b, (D,), jnp.float32)

    # fn = Linear(D, D)
    w = jax.random.normal(k_w, (D, D), jnp.float32) / jnp.sqrt(D)
    b = 0.1 * jax.random.normal(k_bias, (D,), jnp.float32)

    # --- f32 path: parity with the f32 nn.LayerNorm + nn.Linear --------------
    out = jax.block_until_ready(prenorm_linear(x, gamma, beta, w, b))
    ref = prenorm_reference(x, gamma, beta, w, b)
    assert out.shape == (B, S, D)
    assert jnp.allclose(out, ref, atol=1e-3, rtol=1e-3), "f32 mismatch vs reference"

    # --- bf16 path: production config (bf16 MXU feed, f32 stats/accum);
    #     tolerance loosened slightly since gamma is folded into the bf16
    #     weight in the fused kernel. -------------------------------------
    x_bf = x.astype(jnp.bfloat16)
    w_bf = w.astype(jnp.bfloat16)
    out_bf = jax.block_until_ready(prenorm_linear(x_bf, gamma, beta, w_bf, b))
    ref_bf = prenorm_reference(x_bf, gamma, beta, w_bf, b)
    assert out_bf.shape == (B, S, D)
    assert jnp.allclose(
        out_bf.astype(jnp.float32), ref_bf.astype(jnp.float32), atol=5e-2, rtol=5e-2
    ), "bf16 mismatch vs reference"

    print("KERNEL_OK")
</pallas_src>

<mosaic_0001>
module attributes {stable_mosaic.version = 11 : i64} {
  func.func @prenorm_kernel(%arg0: i32, %arg1: i32, %arg2: memref<8x32xf32, #tpu.memory_space<vmem>>, %arg3: memref<32x32xf32, #tpu.memory_space<vmem>>, %arg4: memref<1x32xf32, #tpu.memory_space<vmem>>, %arg5: memref<8x32xf32, #tpu.memory_space<vmem>>, %arg6: memref<8x32xf32, #tpu.memory_space<vmem>>) attributes {dimension_semantics = [#tpu.dimension_semantics<parallel>, #tpu.dimension_semantics<arbitrary>], iteration_bounds = array<i64: 2, 1>, scalar_prefetch = 0 : i64, scratch_operands = 1 : i64, tpu.core_type = #tpu.core_type<tc>, window_params = [{transform_indices = @transform_0, window_bounds = array<i64: 8, 32>}, {pipeline_mode = #tpu.pipeline_mode<synchronous>, transform_indices = @transform_1, window_bounds = array<i64: 32, 32>}, {pipeline_mode = #tpu.pipeline_mode<synchronous>, transform_indices = @transform_2, window_bounds = array<i64: 1, 32>}, {transform_indices = @transform_3, window_bounds = array<i64: 8, 32>}]} {
    %c0_i32 = arith.constant 0 : i32
    %0 = arith.cmpi eq, %arg1, %c0_i32 : i32
    %1 = arith.extui %0 : i1 to i32
    %c0_i32_0 = arith.constant 0 : i32
    %2 = arith.cmpi ne, %1, %c0_i32_0 : i32
    scf.if %2 {
      %c0_8 = arith.constant 0 : index
      %c0_9 = arith.constant 0 : index
      %10 = vector.load %arg2[%c0_8, %c0_9] : memref<8x32xf32, #tpu.memory_space<vmem>>, vector<8x32xf32>
      %cst_10 = arith.constant dense<0.000000e+00> : vector<8xf32>
      %11 = vector.multi_reduction <add>, %10, %cst_10 [1] : vector<8x32xf32> to vector<8xf32>
      %12 = vector.shape_cast %11 : vector<8xf32> to vector<8x1xf32>
      %cst_11 = arith.constant 3.200000e+01 : f32
      %13 = vector.broadcast %cst_11 : f32 to vector<8x1xf32>
      %14 = arith.divf %12, %13 : vector<8x1xf32>
      %15 = vector.broadcast %14 : vector<8x1xf32> to vector<8x32xf32>
      %16 = arith.subf %10, %15 : vector<8x32xf32>
      %17 = arith.mulf %16, %16 : vector<8x32xf32>
      %cst_12 = arith.constant dense<0.000000e+00> : vector<8xf32>
      %18 = vector.multi_reduction <add>, %17, %cst_12 [1] : vector<8x32xf32> to vector<8xf32>
      %19 = vector.shape_cast %18 : vector<8xf32> to vector<8x1xf32>
      %cst_13 = arith.constant 3.200000e+01 : f32
      %20 = vector.broadcast %cst_13 : f32 to vector<8x1xf32>
      %21 = arith.divf %19, %20 : vector<8x1xf32>
      %cst_14 = arith.constant 9.99999974E-6 : f32
      %22 = vector.broadcast %cst_14 : f32 to vector<8x1xf32>
      %23 = arith.addf %21, %22 : vector<8x1xf32>
      %24 = math.rsqrt %23 : vector<8x1xf32>
      %25 = vector.broadcast %24 : vector<8x1xf32> to vector<8x32xf32>
      %26 = arith.mulf %16, %25 : vector<8x32xf32>
      %c0_15 = arith.constant 0 : index
      %c0_16 = arith.constant 0 : index
      %27 = vector.load %arg6[%c0_15, %c0_16] : memref<8x32xf32, #tpu.memory_space<vmem>>, vector<8x32xf32>
      tpu.vector_store %arg6[%c0_15, %c0_16], %26 {strides = array<i32>} : memref<8x32xf32, #tpu.memory_space<vmem>>, vector<8x32xf32>,
    } else {
    }
    %c0 = arith.constant 0 : index
    %c0_1 = arith.constant 0 : index
    %3 = vector.load %arg6[%c0, %c0_1] : memref<8x32xf32, #tpu.memory_space<vmem>>, vector<8x32xf32>
    %c0_2 = arith.constant 0 : index
    %c0_3 = arith.constant 0 : index
    %4 = vector.load %arg3[%c0_2, %c0_3] : memref<32x32xf32, #tpu.memory_space<vmem>>, vector<32x32xf32>
    %cst = arith.constant dense<0.000000e+00> : vector<8x32xf32>
    %5 = tpu.matmul %3, %4, %cst {dimension_numbers = #tpu.dot_dimension_numbers<[1], [0], [0], [1], [0, 0, 1, 1], [], []>} : vector<8x32xf32>, vector<32x32xf32>, vector<8x32xf32> -> vector<8x32xf32>
    %c0_4 = arith.constant 0 : index
    %c0_5 = arith.constant 0 : index
    %6 = vector.load %arg4[%c0_4, %c0_5] : memref<1x32xf32, #tpu.memory_space<vmem>>, vector<1x32xf32>
    %7 = vector.broadcast %6 : vector<1x32xf32> to vector<8x32xf32>
    %8 = arith.addf %5, %7 : vector<8x32xf32>
    %c0_6 = arith.constant 0 : index
    %c0_7 = arith.constant 0 : index
    %9 = vector.load %arg5[%c0_6, %c0_7] : memref<8x32xf32, #tpu.memory_space<vmem>>, vector<8x32xf32>
    tpu.vector_store %arg5[%c0_6, %c0_7], %8 {strides = array<i32>} : memref<8x32xf32, #tpu.memory_space<vmem>>, vector<8x32xf32>,
    return
  }
  func.func @transform_0(%arg0: i32, %arg1: i32) -> (i32, i32) {
    %c0_i32 = arith.constant 0 : i32
    %c0_i32_0 = arith.constant 0 : i32
    return %arg0, %c0_i32 : i32, i32
  }
  func.func @transform_1(%arg0: i32, %arg1: i32) -> (i32, i32) {
    %c0_i32 = arith.constant 0 : i32
    %c0_i32_0 = arith.constant 0 : i32
    return %c0_i32, %arg1 : i32, i32
  }
  func.func @transform_2(%arg0: i32, %arg1: i32) -> (i32, i32) {
    %c0_i32 = arith.constant 0 : i32
    %c0_i32_0 = arith.constant 0 : i32
    return %c0_i32, %arg1 : i32, i32
  }
  func.func @transform_3(%arg0: i32, %arg1: i32) -> (i32, i32) {
    %c0_i32 = arith.constant 0 : i32
    return %arg0, %arg1 : i32, i32
  }
}

</mosaic_0001>

<bundles_post_ra>
// kernel: tpu_custom_call.1
= control target key start
LH: loop header
LB: loop body
LE: loop exit
PB: predicated region body
PF: predicated region fallthrough
CT: control target
= control target key end

     0   :  { %8 = vsyncpa [#allocation4], 0  ;;  %s982_s0 = inlined_call_operand.hbm [shape: f32[16,32], index: 0, kind: input, shape index: {}]   ;;  %s983_s1 = inlined_call_operand.hbm [shape: f32[32,32], index: 1, kind: input, shape index: {}]   ;;  %s984_s2 = inlined_call_operand.vmem [shape: f32[1,32], index: 2, kind: input, shape index: {}]   ;;  %s985_s3 = inlined_call_operand.hbm [shape: f32[16,32], index: 3, kind: output, shape index: {}]  }
   0x1   :  { %10 = vsyncpa [#allocation4 + $0x1], 0 }
   0x2   :  { %11 = vsyncpa [#allocation7], 0 }
   0x3   :  { %12 = vsyncpa [#allocation5], 0 }
   0x4   :  { %14 = vsyncpa [#allocation5 + $0x1], 0  ;;  %s756_s12 = smov 0   ;;  %s758_s13 = smov 0  }
   0x5   :  { %s760_s14 = smov 0   ;;  %s762_s15 = smov 0  }
   0x6   :  { %s764_s16 = smov 0   ;;  %s766_s17 = smov 0  }
   0x7 LB: > { %s462_s18 = sadd.s32 4294967295, %s726_s17   ;;  %s463_s19 = sadd.s32 4294967294, %s726_s17   ;;  %s726_s17 = sphi %s766_s17, %s20_s17   ;;  %s722_s16 = sphi %s764_s16, %s1009_s16   ;;  %s718_s15 = sphi %s762_s15, %s1008_s15   ;;  %s714_s14 = sphi %s760_s14, %s1007_s14   ;;  %s710_s13 = sphi %s758_s13, %s1006_s13   ;;  %s706_s12 = sphi %s756_s12, %s1005_s12  }
   0x8   : > { %p52_p0 = scmp.ne.s32.totalorder %s710_s13, %s706_s12  ;;  %p790_p1 = scmp.eq.s32.totalorder %s462_s18, 0 }
   0x9   : > { %p794_p2 = scmp.eq.s32.totalorder %s462_s18, 1  ;;  %p136_p3 = scmp.eq.s32.totalorder %s463_s19, 1 }
   0xa   : > { %s990_s20 = scalar_select %p790_p1, 1, 0 }
   0xb   : > { %s991_s21 = scalar_select %p794_p2, 1, 0 }
   0xc   : > { %p800_p4 = por %p790_p1, %p52_p0  ;;  %p464_p5 = scmp.ge.s32.totalorder %s726_s17, 1 }
   0xd   : > { %p805_p6 = por %p136_p3, %p52_p0  ;;  %p143_p7 = scmp.lt.s32.totalorder %s726_s17, 3 }
   0xe   : > { %s992_s22 = scalar_select %p800_p4, 1, 0 }
   0xf   : > { %s993_s23 = scalar_select %p805_p6, 1, 0 }
  0x10   : > { %p810_p8 = pnand %p464_p5, %p143_p7  ;;  %s728_s25 = smov [#allocation6]  }
  0x11   : > { %s157_s26 = sshll.u32 %s728_s25, 4  ;;  %s32_s28 = sadd.s32 1, %s722_s16  ;;  %s158_s26 = int_to_ptr.vmem [resolvable:$true] %s157_s26 }
  0x12   : > { %s994_s24 = scalar_select %p810_p8, 1, 0 }
  0x13   : > { %p510_p9 = pneg %p810_p8  ;;  %s582_s4 = scalar_lea.hbm %s983_s1, 512 }
  0x14   : > { %p583_p12 = scmp.ne.s32.totalorder %s983_s1, %s582_s4  ;;  %p589_p5 = scmp.lt.u32.totalorder %s582_s4, %s983_s1 }
  0x15   : > { %p819_p11 = pnand %p510_p9, %p790_p1 }
  0x17   : > { %p584_p13 = pneg %p819_p11 }
  0x19   : > { %p585_p0 = pnand %p584_p13, %p583_p12 }
  0x1b   : > { %p586_p3 = pneg %p585_p0 }
  0x1d   : > { %p591_p7 = pnand %p589_p5, %p586_p3 }
  0x1f   : > { %594 = shalt.err (!%p591_p7)
}
  0x20   : > { %s595_s9 = scalar_lea.vmem %s158_s26, 512  ;;  %p603_p1 = scmp.lt.s32.totalorder %s158_s26, %s158_s26 }
  0x21   : > { %p596_p9 = scmp.ne.s32.totalorder %s158_s26, %s595_s9  ;;  %p604_p4 = scmp.lt.s32.totalorder %s595_s9, %s595_s9 }
  0x23   : > { %p598_p10 = pnand %p596_p9, %p584_p13  ;;  %p605_p8 = por %p604_p4, %p603_p1 }
  0x25   : > { %p599_p6 = pneg %p598_p10 }
  0x27   : > { %p606_p2 = pnand %p605_p8, %p599_p6 }
  0x29   : > { %609 = shalt.err (!%p606_p2)
}
  0x2a   : > { %s729_s10 = smov 128   ;;  %s730_s11 = smov 8  }
  0x2b   : > { %513 = dma.hbm_to_vmem [thread:$0]  (!%p819_p11), %s983_s1, 512, %s158_s26, [#allocation7], %s729_s10, %s729_s10, %s730_s11  }
  0x2c   : > { %p34_p1 = scmp.ge.s32.totalorder %s32_s28, 2  ;;  %s39_s25 = sadd.s32 1, %s714_s14 }
  0x2d   : > { %p46_p2 = scmp.ne.s32.totalorder %s714_s14, %s710_s13  ;;  %p47_p4 = scmp.eq.s32.totalorder %s726_s17, 0 }
  0x2e   : > { %s1011_s28 = smov (%p34_p1, %s32_s28), 0  ;;  %p997_p8 = scmp.ne.s32.totalorder %s991_s21, 0 }
  0x2f   : > { %p846_p6 = por %p47_p4, %p46_p2  ;;  %s36_s27 = ssub.s32 %s722_s16, %s1011_s28 }
  0x30   : > { %p852_p10 = por %p997_p8, %p46_p2  ;;  %p523_p12 = scmp.lt.s32.totalorder %s726_s17, 2 }
  0x31   : > { %p37_p11 = scmp.eq.s32.totalorder %s36_s27, 0  ;;  %s177_s26 = sand.u32 1, %s714_s14  }
  0x32   : > { %s468_s4 = sshll.u32 %s177_s26, 3  ;;  %s469_s6 = sshll.u32 %s722_s16, 7 }
  0x33   : > { %s861_s5 = scalar_select %p37_p11, %s714_s14, %s39_s25  }
  0x34   : > { %s867_s9 = scalar_lea.hbm %s982_s0, %s469_s6  ;;  %s181_s21 = scalar_lea.vmem [#allocation3], %s468_s4 }
  0x35   : > { %s188_s10 = sshll.u32 %s181_s21, 4  ;;  %p873_p13 = pnand %p523_p12, %p846_p6  ;;  %s869_s10 = int_to_ptr.vmem [resolvable:$true] %s188_s10 }
  0x36   : > { %s178_s18 = scalar_lea.sflag [#allocation4], %s177_s26  ;;  %s610_s19 = scalar_lea.hbm %s867_s9, 128 }
  0x37   : > { %p611_p0 = scmp.ne.s32.totalorder %s867_s9, %s610_s19  ;;  %p612_p3 = pneg %p873_p13 }
  0x38   : > { %s615_s4 = scalar_lea.hbm %s982_s0, 256  ;;  %p616_p9 = scmp.lt.u32.totalorder %s867_s9, %s982_s0 }
  0x39   : > { %p613_p5 = pnand %p612_p3, %p611_p0  ;;  %p617_p1 = scmp.lt.u32.totalorder %s615_s4, %s610_s19 }
  0x3a   : > { %p619_p4 = scmp.lt.u32.totalorder %s610_s19, %s867_s9 }
  0x3b   : > { %p614_p7 = pneg %p613_p5  ;;  %p618_p2 = por %p617_p1, %p616_p9 }
  0x3d   : > { %p620_p6 = por %p619_p4, %p618_p2 }
  0x3f   : > { %p621_p8 = pnand %p620_p6, %p614_p7 }
  0x41   : > { %624 = shalt.err (!%p621_p8)
}
  0x42   : > { %s625_s26 = scalar_lea.vmem %s869_s10, 128  ;;  %s731_s7 = smov [#allocation3]  }
  0x43   : > { %p626_p12 = scmp.ne.s32.totalorder %s869_s10, %s625_s26  ;;  %s630_s8 = sshll.u32 %s731_s7, 4  ;;  %s631_s8 = int_to_ptr.vmem [resolvable:$false] %s630_s8 }
  0x44   : > { %s632_s21 = scalar_lea.vmem %s631_s8, 256  ;;  %p633_p5 = scmp.lt.s32.totalorder %s869_s10, %s631_s8 }
  0x45   : > { %p628_p11 = pnand %p626_p12, %p612_p3  ;;  %p634_p9 = scmp.lt.s32.totalorder %s632_s21, %s625_s26 }
  0x47   : > { %p629_p0 = pneg %p628_p11  ;;  %p635_p1 = por %p634_p9, %p633_p5 }
  0x49   : > { %p636_p2 = pnand %p635_p1, %p629_p0 }
  0x4b   : > { %639 = shalt.err (!%p636_p2)
}
  0x4c   : > { %517 = dma.hbm_to_vmem [thread:$0]  (!%p873_p13), %s867_s9, 128, %s869_s10, %s178_s18  }
  0x4d   : > { %p1000_p7 = scmp.ne.s32.totalorder %s994_s24, 0 }
  0x4e   : > { %s905_s19 = sand.u32 (!%p1000_p7), 1, %s710_s13   ;;  %p1001_p3 = scmp.ne.s32.totalorder (!%p1000_p7), %s992_s22, 0 }
  0x4f   : > { %197 = sbr.rel (%p1000_p7) target bundleno = 636 (0x27c), region = 32  ;;  %s471_s25 = sshll.u32 (!%p1000_p7), %s905_s19, 3 }
  0x50   : > { %s200_s27 = scalar_lea.sflag (!%p1000_p7), [#allocation4], %s905_s19  ;;  %s203_s4 = scalar_lea.vmem (!%p1000_p7), [#allocation3], %s471_s25 }
  0x56   : > { %693 = dma.done.wait (%p1001_p3), %s200_s27, 128  }
  0x57   : > { %695 = vsyncadd (%p1001_p3), %s200_s27, 4294967168  ;;  %p1002_p13 = scmp.ne.s32.totalorder %s990_s20, 0 }
  0x59   : > { %697 = dma.done.wait (%p1002_p13), [#allocation7], 512  }
  0x5a   : > { %699 = vsyncadd (%p1002_p13), [#allocation7], 4294966784  ;;  %vm241_vm0 = vcmask 261120   ;;  %v240_v0 = vld [vmem:[%s203_s4] sm:$0xff]  ;;  %v258_v7 = vld [vmem:[#allocation6] sm:$0xff]  ;;  %v732_v10 = vmov 0.0|0.0  }
  0x5b   : > { %v242_v1 = vsel %vm241_vm0, %v240_v0, 0.0  ;;  %v259_v8 = vld [vmem:[#allocation6 + $0x8] sm:$0xff]  ;;  %496 = vmatprep.subr.bf16.mxu0 %v732_v10  ;;  %v260_v11 = vld [vmem:[#allocation6 + $0x10] sm:$0xff]  ;;  %v261_v12 = vld [vmem:[#allocation6 + $0x18] sm:$0xff]  ;;  %vm733_vm1 = vmmov 0   ;;  %v734_v14 = vmov 0.0  }
  0x5c   : > { %243 = vadd.xlane.f32.xlu0 %v242_v1  ;;  %v497_v9 = vpack.c.bf16 %v259_v8, %v258_v7  ;;  %v500_v13 = vpack.c.bf16 %v261_v12, %v260_v11  ;;  %493 = vmatprep.mubr.msk.f32.mxu0 %vm733_vm1, %v734_v14  ;;  %v474_v21 = vld [vmem:[%s984_s2] ss:$0 sm:$0xff]  ;;  %s477_s24 = sshll.u32 %s718_s15, 7  ;;  %s232_s9 = scalar_lea.vmem [#allocation8], %s471_s25 }
  0x5d   : > { %s359_s10 = sshll.u32 %s232_s9, 4  ;;  %s932_s29 = scalar_lea.hbm %s985_s3, %s477_s24  ;;  %s934_s10 = int_to_ptr.vmem [resolvable:$true] %s359_s10 }
  0x5e   : > { %498 = vmatpush3.bf16.msra.mxu0 %v497_v9  ;;  %s345_s6 = scalar_lea.sflag [#allocation5], %s905_s19  ;;  %s640_s15 = scalar_lea.vmem %s934_s10, 128 }
  0x5f   : > { %499 = vmatprep.subr.bf16.mxu0 %v732_v10  ;;  %p641_p4 = scmp.ne.s32.totalorder %s934_s10, %s640_s15  ;;  %s735_s26 = smov [#allocation8]  }
  0x60   : > { %s644_s7 = sshll.u32 %s735_s26, 4  ;;  %s645_s7 = int_to_ptr.vmem [resolvable:$false] %s644_s7 }
  0x61   : > { %p642_p6 = pnand %p641_p4, %p852_p10  ;;  %s646_s8 = scalar_lea.vmem %s645_s7, 256 }
  0x62   : > { %501 = vmatpush3.bf16.msra.mxu0 %v500_v13  ;;  %p647_p12 = scmp.lt.s32.totalorder %s934_s10, %s645_s7  ;;  %p648_p11 = scmp.lt.s32.totalorder %s646_s8, %s640_s15 }
  0x63   : > { %p643_p8 = pneg %p642_p6 }
  0x64   : > { %p649_p0 = por %p648_p11, %p647_p12 }
  0x66   : > { %p650_p5 = pnand %p649_p0, %p643_p8 }
  0xe9   : > { %v244_v2 = vpop.xlane.xlu0 %243 }
  0xea   : > { %v246_v3 = vmul.f32 0.03125, %v244_v2 }
  0xec   : > { %v247_v4 = vsub.f32 %v240_v0, %v246_v3 }
  0xee   : > { %v248_v5 = vmul.f32 %v247_v4, %v247_v4 }
  0xf0   : > { %v249_v6 = vsel %vm241_vm0, %v248_v5, 0.0 }
  0xf1   : > { %250 = vadd.xlane.f32.xlu0 %v249_v6 }
 0x17e   : > { %v251_v15 = vpop.xlane.xlu0 %250 }
 0x17f   : > { %v252_v16 = vmul.f32 0.03125, %v251_v15 }
 0x181   : > { %v253_v17 = vadd.f32 1e-05, %v252_v16 }
 0x183   : > { %580 = vrsqrt.f32 %v253_v17 }
 0x18d   : > { %v581_v18 = vpop.eup %580 }
 0x18e   : > { %v255_v19 = vmul.f32 %v581_v18, %v247_v4 }
 0x190   : > { %256 = vst.msk [vmem:[#allocation2] sm:$0xff] %vm241_vm0, %v255_v19 }
 0x197   : > { %v257_v20 = vld [vmem:[#allocation2] sm:$0xff] }
 0x198   : > { %494 = vmatmul.mubr.msk.f32.vlgmr.msra.gmra.mrb[0].mxu0 %vm241_vm0, %v257_v20 }
 0x26b   : > { %v339_v22 = vpop.f32.mrb[0].mxu0 }
 0x26c   : > { %v340_v23 = vadd.f32 %v474_v21, %v339_v22  ;;  %v495_v24 = vpop.f32.mrb[1].mxu0 }
 0x26e   : > { %343 = vst.msk [vmem:[%s232_s9] sm:$0xff] %vm241_vm0, %v340_v23 }
 0x26f   : > { %653 = shalt.err (!%p650_p5)
}
 0x270   : > { %s654_s21 = scalar_lea.hbm %s932_s29, 128  ;;  %s658_s27 = scalar_lea.hbm %s985_s3, 256 }
 0x271   : > { %p655_p9 = scmp.ne.s32.totalorder %s932_s29, %s654_s21  ;;  %p659_p7 = scmp.lt.u32.totalorder %s932_s29, %s985_s3 }
 0x272   : > { %p660_p3 = scmp.lt.u32.totalorder %s658_s27, %s654_s21  ;;  %p662_p4 = scmp.lt.u32.totalorder %s654_s21, %s932_s29 }
 0x273   : > { %p656_p1 = pnand %p655_p9, %p852_p10 }
 0x274   : > { %p661_p13 = por %p660_p3, %p659_p7 }
 0x275   : > { %p657_p2 = pneg %p656_p1 }
 0x276   : > { %p663_p6 = por %p662_p4, %p661_p13 }
 0x278   : > { %p664_p8 = pnand %p663_p6, %p657_p2 }
 0x27a   : > { %667 = shalt.err (!%p664_p8)
}
 0x27b   : > { %508 = dma.vmem_to_hbm [thread:$0]  (%p852_p10), %s934_s10, 128, %s932_s29, %s345_s6  }
 0x27c PF: > { %s371_s22 = sand.u32 1, %s706_s12   ;;  %p1003_p12 = scmp.ne.s32.totalorder %s993_s23, 0 }
 0x27d   : > { %p1004_p11 = scmp.ge.s32.totalorder %s726_s17, 2  ;;  %s372_s24 = scalar_lea.sflag [#allocation5], %s371_s22 }
 0x27f   : > { %p519_p0 = pnand %p1004_p11, %p1003_p12 }
 0x281   : > { %701 = dma.done.wait (!%p519_p0), %s372_s24, 128  }
 0x282   : > { %703 = vsyncadd (!%p519_p0), %s372_s24, 4294967168  ;;  %s20_s17 = sadd.s32 1, %s726_s17   ;;  %s1005_s12 = smov %s710_s13 }
 0x283   : > { %p17_p5 = scmp.ge.s32.totalorder %s20_s17, 4   ;;  %s1006_s13 = smov %s714_s14 }
 0x284   : > { %s1007_s14 = smov %s861_s5  ;;  %s1008_s15 = smov %s722_s16 }
 0x285   : > { %s1009_s16 = smov %s1011_s28  ;;  %19 = sbr.rel (!%p17_p5) target bundleno = 7 (0x7), region = 89 }
 0x28c   :  { %377 = vsyncpa [#allocation4], 1 }
 0x28d   :  { %379 = vsyncpa [#allocation4 + $0x1], 1 }
 0x28e   :  { %380 = vsyncpa [#allocation7], 1 }
 0x28f   :  { %381 = vsyncpa [#allocation5], 1 }
 0x290   :  { %383 = vsyncpa [#allocation5 + $0x1], 1 }

</bundles_post_ra>
